<compile_context>
chip_gen: v5e
topology: v5e:2x2
jax: 0.10.0
libtpu: 0.0.40
codegen_flags: <defaults>
</compile_context>

<pallas_src>
import functools
import math

import jax
import jax.numpy as jnp
from jax.experimental import pallas as pl
from jax.experimental.pallas import tpu as pltpu

LOG_STD_MIN = -20.0
LOG_STD_MAX = 2.0
_HALF_LOG_2PI = 0.5 * math.log(2.0 * math.pi)
_LOG_2 = math.log(2.0)


def _round_up(x, m):
    return ((x + m - 1) // m) * m


def _actor_kernel(obs_ref, w1_ref, b1_ref, w2_ref, b2_ref, wh_ref, bh_ref,
                  eps_ref, out_ref, eps_buf, *, act_dim, out_lanes):
    """One batch block of the SAC Actor forward pass.

    Weight refs hold the whole (small) parameter matrices; their BlockSpecs use
    a constant index_map so they are fetched once and stay VMEM-resident across
    the batch grid.  The mu / log_std heads are fused into one (H, 2*out_lanes)
    f32 matmul whose columns are zero-padded to 128 lanes so the elementwise
    tail and the output store are fully lane-dense.
    """
    mm_dtype = w1_ref.dtype

    # ---- eps arrives narrow (tb, act_dim): splat into a zeroed 128-lane scratch.
    # Lanes [act_dim:] stay exactly 0, so padded lanes contribute exactly 0 to
    # the logp reduction below.  Zeroed once; only lanes [0:act_dim] are ever
    # rewritten on later blocks.
    @pl.when(pl.program_id(0) == 0)
    def _():
        eps_buf[...] = jnp.zeros_like(eps_buf)

    eps_buf[:, :act_dim] = eps_ref[...]
    eps = eps_buf[...]

    # ---- MLP trunk: Linear -> ReLU -> Linear -> ReLU (obs already in mm dtype).
    h = jnp.dot(obs_ref[...], w1_ref[...],
                preferred_element_type=jnp.float32) + b1_ref[...]
    h = jnp.maximum(h, 0.0)
    h = jnp.dot(h.astype(mm_dtype), w2_ref[...],
                preferred_element_type=jnp.float32) + b2_ref[...]
    h = jnp.maximum(h, 0.0)

    # ---- fused mu / log_std heads: one f32 matmul (tiny + VMEM-resident; f32
    # keeps log_std / logp accurate even when the trunk runs in bf16).
    y = jnp.dot(h, wh_ref[...], preferred_element_type=jnp.float32) + bh_ref[...]
    mu = y[:, :out_lanes]                                            # padded -> 0
    log_std = jnp.clip(y[:, out_lanes:], LOG_STD_MIN, LOG_STD_MAX)   # padded -> 0
    std = jnp.exp(log_std)                                           # padded -> 1

    # ---- rsample: pi = mu + std * eps   (padded lanes: 0 + 1*0 = 0)
    pi = mu + std * eps

    # ---- log-prob.  z = (pi - mu)/std == eps exactly -> no divide.
    # Normal log-prob + tanh-squash correction fused into ONE lane reduction;
    # padded lanes contribute exactly 0 (eps=0, log_std=0, corr(pi=0)=0), the
    # constant term is hoisted out as a scalar.
    t = -2.0 * pi
    softplus_t = jnp.maximum(t, 0.0) + jnp.log1p(jnp.exp(-jnp.abs(t)))
    corr = 2.0 * (_LOG_2 - pi - softplus_t)
    per_lane = -0.5 * eps * eps - log_std - corr
    logp = jnp.sum(per_lane, axis=-1, keepdims=True) - act_dim * _HALF_LOG_2PI

    # ---- single lane-dense output slab: lanes [0:A] = pi_action, lane A = logp.
    # TODO(synk): the slab could be emitted in bf16 to halve the write stream if
    # downstream tolerates it; kept f32 since logp feeds the SAC losses.
    lane = jax.lax.broadcasted_iota(jnp.int32, out_ref.shape, 1)
    out_ref[...] = jnp.where(lane == act_dim, pi + logp, pi)


def prepare_actor_params(params, act_dim, out_lanes, matmul_dtype=jnp.bfloat16,
                         hidden_multiple=128):
    """Fuse + pad parameters for the kernel.

    * hidden sizes are zero-padded to multiples of `hidden_multiple` (128; use
      256 to match the 2x256^2 MXU on v6e/v7x) -- exact math since ReLU(0)=0 and
      the padded weight rows/cols are zero; weights are VMEM-resident so padding
      costs no HBM traffic.
    * mu / log_std heads are concatenated into one (H, 2*out_lanes) f32 weight.
      The padded columns MUST remain exactly zero: the in-kernel logp reduction
      relies on padded lanes contributing exactly 0.
    * trunk matmul operands are cast to `matmul_dtype`; biases and the fused
      head stay f32.
    """
    in_dim, h1 = params["w1"].shape
    h2 = params["w2"].shape[1]
    h1p = _round_up(h1, hidden_multiple)
    h2p = _round_up(h2, hidden_multiple)

    w1 = jnp.zeros((in_dim, h1p), jnp.float32).at[:, :h1].set(params["w1"])
    b1 = jnp.zeros((1, h1p), jnp.float32).at[:, :h1].set(params["b1"])
    w2 = jnp.zeros((h1p, h2p), jnp.float32).at[:h1, :h2].set(params["w2"])
    b2 = jnp.zeros((1, h2p), jnp.float32).at[:, :h2].set(params["b2"])

    wh = jnp.zeros((h2p, 2 * out_lanes), jnp.float32)
    wh = wh.at[:h2, :act_dim].set(params["wmu"])
    wh = wh.at[:h2, out_lanes:out_lanes + act_dim].set(params["wls"])
    bh = jnp.zeros((1, 2 * out_lanes), jnp.float32)
    bh = bh.at[:, :act_dim].set(params["bmu"])
    bh = bh.at[:, out_lanes:out_lanes + act_dim].set(params["bls"])

    return dict(
        w1=w1.astype(matmul_dtype), b1=b1,
        w2=w2.astype(matmul_dtype), b2=b2,
        wh=wh, bh=bh,                      # head kept f32 for logp accuracy
    )


def _choose_block_rows(B, block_rows):
    """Pick the batch block size.

    Large blocks (default 2048 rows) amortize the ~0.35 us per-grid-step cost;
    for B >= 512 we keep at least two blocks so v7x's two TensorCores both get
    work via the "parallel" batch axis.  Small batches use a single full-extent
    block (always a legal BlockSpec).  VMEM is never the constraint here:
    block + weights + double-buffering stays well under v7x's 64 MiB.
    """
    tb = _round_up(min(block_rows, max(B, 1)), 8)
    if tb >= B:
        if B >= 512:
            return _round_up(pl.cdiv(B, 2), 8)   # >= 2 blocks for v7x megacore
        return B                                  # single full-extent block
    return tb


def actor_forward(obs, params, eps, *, block_rows=2048, matmul_dtype=jnp.bfloat16):
    """SAC Actor forward (stochastic path, with_logprob=True).

    Returns (pi_action (B, A) f32, logp_pi (B,) f32), matching the reference
    torch module (raw rsample action + tanh-corrected log-prob).
    """
    B, in_dim = obs.shape
    act_dim = eps.shape[1]
    assert act_dim < 128, "logp lane slot requires act_dim < 128"
    out_lanes = 128  # actions + logp fit one 128-lane vreg slab

    fused = prepare_actor_params(params, act_dim, out_lanes, matmul_dtype)
    h1p = fused["w1"].shape[1]
    h2p = fused["w2"].shape[1]

    # No batch zero-pad copies: grid = ceil(B / tb); tail block overruns (OOB
    # reads undefined, OOB writes dropped -- those rows never exist in the out).
    tb = _choose_block_rows(B, block_rows)
    grid = (pl.cdiv(B, tb),)

    obs_mm = obs.astype(matmul_dtype)   # bf16 obs: half the obs DMA + buffers
    eps_f32 = eps.astype(jnp.float32)   # narrow (B, act_dim) -- no 128-lane pad

    row = lambda i: (i, 0)     # batch-tiled operands (pipelined / double-buffered)
    const = lambda i: (0, 0)   # VMEM-resident weights (fetched once)

    mm_bytes = jnp.dtype(matmul_dtype).itemsize
    cost = pl.CostEstimate(
        flops=int(2 * B * (in_dim * h1p + h1p * h2p + h2p * 2 * out_lanes)),
        transcendentals=int(3 * B * out_lanes),
        bytes_accessed=int(
            B * in_dim * mm_bytes            # obs
            + B * act_dim * 4                # eps (narrow)
            + B * out_lanes * 4              # output slab
            + (in_dim * h1p + h1p * h2p) * mm_bytes
            + (h2p * 2 * out_lanes + h1p + h2p + 2 * out_lanes) * 4),
    )

    kernel = functools.partial(_actor_kernel, act_dim=act_dim, out_lanes=out_lanes)
    slab = pl.pallas_call(
        kernel,
        out_shape=jax.ShapeDtypeStruct((B, out_lanes), jnp.float32),
        grid=grid,
        in_specs=[
            pl.BlockSpec((tb, in_dim), row),
            pl.BlockSpec((in_dim, h1p), const),
            pl.BlockSpec((1, h1p), const),
            pl.BlockSpec((h1p, h2p), const),
            pl.BlockSpec((1, h2p), const),
            pl.BlockSpec((h2p, 2 * out_lanes), const),
            pl.BlockSpec((1, 2 * out_lanes), const),
            pl.BlockSpec((tb, act_dim), row),
        ],
        out_specs=pl.BlockSpec((tb, out_lanes), row),
        scratch_shapes=[pltpu.VMEM((tb, out_lanes), jnp.float32)],
        compiler_params=pltpu.CompilerParams(
            dimension_semantics=("parallel",)),
        cost_estimate=cost,
    )(obs_mm, fused["w1"], fused["b1"], fused["w2"], fused["b2"],
      fused["wh"], fused["bh"], eps_f32)

    pi_action = slab[:, :act_dim]
    logp_pi = slab[:, act_dim]
    return pi_action, logp_pi


def init_params(key, input_size, hidden_sizes, output_size):
    """Deterministic synthetic init (shapes match the torch module's Linears)."""
    sizes = [input_size] + list(hidden_sizes)
    keys = jax.random.split(key, 4)

    def lin(k, fan_in, fan_out):
        scale = 1.0 / jnp.sqrt(jnp.float32(fan_in))
        w = jax.random.uniform(k, (fan_in, fan_out), jnp.float32, -scale, scale)
        b = jnp.zeros((1, fan_out), jnp.float32)
        return w, b

    w1, b1 = lin(keys[0], sizes[0], sizes[1])
    w2, b2 = lin(keys[1], sizes[1], sizes[2])
    wmu, bmu = lin(keys[2], sizes[2], output_size)
    wls, bls = lin(keys[3], sizes[2], output_size)
    return dict(w1=w1, b1=b1, w2=w2, b2=b2,
                wmu=wmu, bmu=bmu, wls=wls, bls=bls)


def actor_reference(obs, params, eps):
    """Pure-JAX reference mirroring the torch module (f32, highest precision)."""
    hp = jax.lax.Precision.HIGHEST
    h = jax.nn.relu(jnp.dot(obs, params["w1"], precision=hp) + params["b1"])
    h = jax.nn.relu(jnp.dot(h, params["w2"], precision=hp) + params["b2"])
    mu = jnp.dot(h, params["wmu"], precision=hp) + params["bmu"]
    log_std = jnp.clip(jnp.dot(h, params["wls"], precision=hp) + params["bls"],
                       LOG_STD_MIN, LOG_STD_MAX)
    std = jnp.exp(log_std)
    pi = mu + std * eps
    logp = jnp.sum(-0.5 * ((pi - mu) / std) ** 2 - log_std - _HALF_LOG_2PI, axis=-1)
    logp -= jnp.sum(2.0 * (math.log(2.0) - pi - jax.nn.softplus(-2.0 * pi)), axis=-1)
    return pi, logp


if __name__ == "__main__":
    key = jax.random.PRNGKey(0)

    # ---- config 1: tiny batch, single block -------------------------------
    B, INPUT, HIDDEN, ACT = 8, 16, (32, 32), 8
    k_param, k_obs, k_eps, key = jax.random.split(key, 4)
    params = init_params(k_param, INPUT, HIDDEN, ACT)
    obs = jax.random.normal(k_obs, (B, INPUT), jnp.float32)
    eps = jax.random.normal(k_eps, (B, ACT), jnp.float32)  # rsample noise

    pi_ref, lp_ref = actor_reference(obs, params, eps)

    # f32 matmul path: checked against the pure-JAX reference.
    pi32, lp32 = actor_forward(obs, params, eps, matmul_dtype=jnp.float32)
    jax.block_until_ready((pi32, lp32))
    assert pi32.shape == (B, ACT) and lp32.shape == (B,)
    assert jnp.allclose(pi32, pi_ref, atol=2e-2, rtol=2e-2)
    assert jnp.allclose(lp32, lp_ref, atol=2e-1, rtol=2e-2)

    # Default perf path (bf16 trunk, f32 head / accumulation / elementwise).
    pi16, lp16 = actor_forward(obs, params, eps)
    jax.block_until_ready((pi16, lp16))
    assert pi16.shape == (B, ACT) and lp16.shape == (B,)
    assert bool(jnp.all(jnp.isfinite(pi16))) and bool(jnp.all(jnp.isfinite(lp16)))
    assert float(jnp.max(jnp.abs(pi16 - pi32))) < 1.0
    assert float(jnp.max(jnp.abs(lp16 - lp32))) < 0.5

    # ---- config 2: multi-block grid with a non-divisible tail block --------
    B2, IN2, HID2, ACT2 = 100, 16, (64, 64), 6
    k_param2, k_obs2, k_eps2, key = jax.random.split(key, 4)
    params2 = init_params(k_param2, IN2, HID2, ACT2)
    obs2 = jax.random.normal(k_obs2, (B2, IN2), jnp.float32)
    eps2 = jax.random.normal(k_eps2, (B2, ACT2), jnp.float32)

    pi_ref2, lp_ref2 = actor_reference(obs2, params2, eps2)
    pi2, lp2 = actor_forward(obs2, params2, eps2, block_rows=32,
                             matmul_dtype=jnp.float32)
    jax.block_until_ready((pi2, lp2))
    assert pi2.shape == (B2, ACT2) and lp2.shape == (B2,)
    assert jnp.allclose(pi2, pi_ref2, atol=2e-2, rtol=2e-2)
    assert jnp.allclose(lp2, lp_ref2, atol=2e-1, rtol=2e-2)

    print("KERNEL_OK")
</pallas_src>

<mosaic_0001>
module attributes {stable_mosaic.version = 11 : i64} {
  func.func @_actor_kernel(%arg0: i32, %arg1: memref<8x16xf32, #tpu.memory_space<vmem>>, %arg2: memref<16x128xf32, #tpu.memory_space<vmem>>, %arg3: memref<1x128xf32, #tpu.memory_space<vmem>>, %arg4: memref<128x128xf32, #tpu.memory_space<vmem>>, %arg5: memref<1x128xf32, #tpu.memory_space<vmem>>, %arg6: memref<128x256xf32, #tpu.memory_space<vmem>>, %arg7: memref<1x256xf32, #tpu.memory_space<vmem>>, %arg8: memref<8x8xf32, #tpu.memory_space<vmem>>, %arg9: memref<8x128xf32, #tpu.memory_space<vmem>>, %arg10: memref<8x128xf32, #tpu.memory_space<vmem>>) attributes {dimension_semantics = [#tpu.dimension_semantics<parallel>], iteration_bounds = array<i64: 1>, scalar_prefetch = 0 : i64, scratch_operands = 1 : i64, tpu.core_type = #tpu.core_type<tc>, window_params = [{transform_indices = @transform_0, window_bounds = array<i64: 8, 16>}, {pipeline_mode = #tpu.pipeline_mode<synchronous>, transform_indices = @transform_1, window_bounds = array<i64: 16, 128>}, {pipeline_mode = #tpu.pipeline_mode<synchronous>, transform_indices = @transform_2, window_bounds = array<i64: 1, 128>}, {pipeline_mode = #tpu.pipeline_mode<synchronous>, transform_indices = @transform_3, window_bounds = array<i64: 128, 128>}, {pipeline_mode = #tpu.pipeline_mode<synchronous>, transform_indices = @transform_4, window_bounds = array<i64: 1, 128>}, {pipeline_mode = #tpu.pipeline_mode<synchronous>, transform_indices = @transform_5, window_bounds = array<i64: 128, 256>}, {pipeline_mode = #tpu.pipeline_mode<synchronous>, transform_indices = @transform_6, window_bounds = array<i64: 1, 256>}, {transform_indices = @transform_7, window_bounds = array<i64: 8, 8>}, {transform_indices = @transform_8, window_bounds = array<i64: 8, 128>}]} {
    %c0_i32 = arith.constant 0 : i32
    %0 = arith.cmpi eq, %arg0, %c0_i32 : i32
    %1 = arith.extui %0 : i1 to i32
    %c0_i32_0 = arith.constant 0 : i32
    %2 = arith.cmpi ne, %1, %c0_i32_0 : i32
    scf.if %2 {
      %cst_36 = arith.constant 0.000000e+00 : f32
      %66 = vector.broadcast %cst_36 : f32 to vector<8x128xf32>
      %c0_37 = arith.constant 0 : index
      %c0_38 = arith.constant 0 : index
      %67 = vector.load %arg10[%c0_37, %c0_38] : memref<8x128xf32, #tpu.memory_space<vmem>>, vector<8x128xf32>
      tpu.vector_store %arg10[%c0_37, %c0_38], %66 {strides = array<i32>} : memref<8x128xf32, #tpu.memory_space<vmem>>, vector<8x128xf32>,
    } else {
    }
    %c0 = arith.constant 0 : index
    %c0_1 = arith.constant 0 : index
    %3 = vector.load %arg8[%c0, %c0_1] : memref<8x8xf32, #tpu.memory_space<vmem>>, vector<8x8xf32>
    %c0_2 = arith.constant 0 : index
    %c0_3 = arith.constant 0 : index
    %4 = vector.load %arg10[%c0_2, %c0_3] : memref<8x128xf32, #tpu.memory_space<vmem>>, vector<8x8xf32>
    tpu.vector_store %arg10[%c0_2, %c0_3], %3 {strides = array<i32>} : memref<8x128xf32, #tpu.memory_space<vmem>>, vector<8x8xf32>,
    %c0_4 = arith.constant 0 : index
    %c0_5 = arith.constant 0 : index
    %5 = vector.load %arg10[%c0_4, %c0_5] : memref<8x128xf32, #tpu.memory_space<vmem>>, vector<8x128xf32>
    %c0_6 = arith.constant 0 : index
    %c0_7 = arith.constant 0 : index
    %6 = vector.load %arg1[%c0_6, %c0_7] : memref<8x16xf32, #tpu.memory_space<vmem>>, vector<8x16xf32>
    %c0_8 = arith.constant 0 : index
    %c0_9 = arith.constant 0 : index
    %7 = vector.load %arg2[%c0_8, %c0_9] : memref<16x128xf32, #tpu.memory_space<vmem>>, vector<16x128xf32>
    %cst = arith.constant dense<0.000000e+00> : vector<8x128xf32>
    %8 = tpu.matmul %6, %7, %cst {dimension_numbers = #tpu.dot_dimension_numbers<[1], [0], [0], [1], [0, 0, 1, 1], [], []>} : vector<8x16xf32>, vector<16x128xf32>, vector<8x128xf32> -> vector<8x128xf32>
    %c0_10 = arith.constant 0 : index
    %c0_11 = arith.constant 0 : index
    %9 = vector.load %arg3[%c0_10, %c0_11] : memref<1x128xf32, #tpu.memory_space<vmem>>, vector<1x128xf32>
    %10 = vector.broadcast %9 : vector<1x128xf32> to vector<8x128xf32>
    %11 = arith.addf %8, %10 : vector<8x128xf32>
    %cst_12 = arith.constant 0.000000e+00 : f32
    %12 = vector.broadcast %cst_12 : f32 to vector<8x128xf32>
    %13 = arith.maximumf %11, %12 : vector<8x128xf32>
    %c0_13 = arith.constant 0 : index
    %c0_14 = arith.constant 0 : index
    %14 = vector.load %arg4[%c0_13, %c0_14] : memref<128x128xf32, #tpu.memory_space<vmem>>, vector<128x128xf32>
    %cst_15 = arith.constant dense<0.000000e+00> : vector<8x128xf32>
    %15 = tpu.matmul %13, %14, %cst_15 {dimension_numbers = #tpu.dot_dimension_numbers<[1], [0], [0], [1], [0, 0, 1, 1], [], []>} : vector<8x128xf32>, vector<128x128xf32>, vector<8x128xf32> -> vector<8x128xf32>
    %c0_16 = arith.constant 0 : index
    %c0_17 = arith.constant 0 : index
    %16 = vector.load %arg5[%c0_16, %c0_17] : memref<1x128xf32, #tpu.memory_space<vmem>>, vector<1x128xf32>
    %17 = vector.broadcast %16 : vector<1x128xf32> to vector<8x128xf32>
    %18 = arith.addf %15, %17 : vector<8x128xf32>
    %cst_18 = arith.constant 0.000000e+00 : f32
    %19 = vector.broadcast %cst_18 : f32 to vector<8x128xf32>
    %20 = arith.maximumf %18, %19 : vector<8x128xf32>
    %c0_19 = arith.constant 0 : index
    %c0_20 = arith.constant 0 : index
    %21 = vector.load %arg6[%c0_19, %c0_20] : memref<128x256xf32, #tpu.memory_space<vmem>>, vector<128x256xf32>
    %cst_21 = arith.constant dense<0.000000e+00> : vector<8x256xf32>
    %22 = tpu.matmul %20, %21, %cst_21 {dimension_numbers = #tpu.dot_dimension_numbers<[1], [0], [0], [1], [0, 0, 1, 1], [], []>} : vector<8x128xf32>, vector<128x256xf32>, vector<8x256xf32> -> vector<8x256xf32>
    %c0_22 = arith.constant 0 : index
    %c0_23 = arith.constant 0 : index
    %23 = vector.load %arg7[%c0_22, %c0_23] : memref<1x256xf32, #tpu.memory_space<vmem>>, vector<1x256xf32>
    %24 = vector.broadcast %23 : vector<1x256xf32> to vector<8x256xf32>
    %25 = arith.addf %22, %24 : vector<8x256xf32>
    %26 = vector.extract_strided_slice %25 {offsets = [0, 0], sizes = [8, 128], strides = [1, 1]} : vector<8x256xf32> to vector<8x128xf32>
    %27 = vector.extract_strided_slice %25 {offsets = [0, 128], sizes = [8, 128], strides = [1, 1]} : vector<8x256xf32> to vector<8x128xf32>
    %cst_24 = arith.constant -2.000000e+01 : f32
    %cst_25 = arith.constant 2.000000e+00 : f32
    %28 = vector.broadcast %cst_24 : f32 to vector<8x128xf32>
    %29 = arith.maximumf %28, %27 : vector<8x128xf32>
    %30 = vector.broadcast %cst_25 : f32 to vector<8x128xf32>
    %31 = arith.minimumf %30, %29 : vector<8x128xf32>
    %32 = math.exp %31 : vector<8x128xf32>
    %33 = arith.mulf %32, %5 : vector<8x128xf32>
    %34 = arith.addf %26, %33 : vector<8x128xf32>
    %cst_26 = arith.constant -2.000000e+00 : f32
    %35 = vector.broadcast %cst_26 : f32 to vector<8x128xf32>
    %36 = arith.mulf %35, %34 : vector<8x128xf32>
    %cst_27 = arith.constant 0.000000e+00 : f32
    %37 = vector.broadcast %cst_27 : f32 to vector<8x128xf32>
    %38 = arith.maximumf %36, %37 : vector<8x128xf32>
    %39 = math.absf %36 : vector<8x128xf32>
    %cst_28 = arith.constant 0.000000e+00 : f32
    %40 = vector.broadcast %cst_28 : f32 to vector<8x128xf32>
    %41 = arith.subf %40, %39 : vector<8x128xf32>
    %42 = math.exp %41 : vector<8x128xf32>
    %43 = math.log1p %42 : vector<8x128xf32>
    %44 = arith.addf %38, %43 : vector<8x128xf32>
    %cst_29 = arith.constant 0.693147182 : f32
    %45 = vector.broadcast %cst_29 : f32 to vector<8x128xf32>
    %46 = arith.subf %45, %34 : vector<8x128xf32>
    %47 = arith.subf %46, %44 : vector<8x128xf32>
    %cst_30 = arith.constant 2.000000e+00 : f32
    %48 = vector.broadcast %cst_30 : f32 to vector<8x128xf32>
    %49 = arith.mulf %48, %47 : vector<8x128xf32>
    %cst_31 = arith.constant -5.000000e-01 : f32
    %50 = vector.broadcast %cst_31 : f32 to vector<8x128xf32>
    %51 = arith.mulf %50, %5 : vector<8x128xf32>
    %52 = arith.mulf %51, %5 : vector<8x128xf32>
    %53 = arith.subf %52, %31 : vector<8x128xf32>
    %54 = arith.subf %53, %49 : vector<8x128xf32>
    %cst_32 = arith.constant dense<0.000000e+00> : vector<8xf32>
    %55 = vector.multi_reduction <add>, %54, %cst_32 [1] : vector<8x128xf32> to vector<8xf32>
    %56 = vector.shape_cast %55 : vector<8xf32> to vector<8x1xf32>
    %cst_33 = arith.constant 7.35150814 : f32
    %57 = vector.broadcast %cst_33 : f32 to vector<8x1xf32>
    %58 = arith.subf %56, %57 : vector<8x1xf32>
    %59 = tpu.iota {dimensions = array<i32: 1>} : vector<8x128xi32>
    %c8_i32 = arith.constant 8 : i32
    %60 = vector.broadcast %c8_i32 : i32 to vector<8x128xi32>
    %61 = arith.cmpi eq, %59, %60 : vector<8x128xi32>
    %62 = vector.broadcast %58 : vector<8x1xf32> to vector<8x128xf32>
    %63 = arith.addf %34, %62 : vector<8x128xf32>
    %64 = arith.select %61, %63, %34 : vector<8x128xi1>, vector<8x128xf32>
    %c0_34 = arith.constant 0 : index
    %c0_35 = arith.constant 0 : index
    %65 = vector.load %arg9[%c0_34, %c0_35] : memref<8x128xf32, #tpu.memory_space<vmem>>, vector<8x128xf32>
    tpu.vector_store %arg9[%c0_34, %c0_35], %64 {strides = array<i32>} : memref<8x128xf32, #tpu.memory_space<vmem>>, vector<8x128xf32>,
    return
  }
  func.func @transform_0(%arg0: i32) -> (i32, i32) {
    %c0_i32 = arith.constant 0 : i32
    %c0_i32_0 = arith.constant 0 : i32
    return %arg0, %c0_i32 : i32, i32
  }
  func.func @transform_1(%arg0: i32) -> (i32, i32) {
    %c0_i32 = arith.constant 0 : i32
    %c0_i32_0 = arith.constant 0 : i32
    %c0_i32_1 = arith.constant 0 : i32
    return %c0_i32, %c0_i32_0 : i32, i32
  }
  func.func @transform_2(%arg0: i32) -> (i32, i32) {
    %c0_i32 = arith.constant 0 : i32
    %c0_i32_0 = arith.constant 0 : i32
    %c0_i32_1 = arith.constant 0 : i32
    return %c0_i32, %c0_i32_0 : i32, i32
  }
  func.func @transform_3(%arg0: i32) -> (i32, i32) {
    %c0_i32 = arith.constant 0 : i32
    %c0_i32_0 = arith.constant 0 : i32
    %c0_i32_1 = arith.constant 0 : i32
    return %c0_i32, %c0_i32_0 : i32, i32
  }
  func.func @transform_4(%arg0: i32) -> (i32, i32) {
    %c0_i32 = arith.constant 0 : i32
    %c0_i32_0 = arith.constant 0 : i32
    %c0_i32_1 = arith.constant 0 : i32
    return %c0_i32, %c0_i32_0 : i32, i32
  }
  func.func @transform_5(%arg0: i32) -> (i32, i32) {
    %c0_i32 = arith.constant 0 : i32
    %c0_i32_0 = arith.constant 0 : i32
    %c0_i32_1 = arith.constant 0 : i32
    return %c0_i32, %c0_i32_0 : i32, i32
  }
  func.func @transform_6(%arg0: i32) -> (i32, i32) {
    %c0_i32 = arith.constant 0 : i32
    %c0_i32_0 = arith.constant 0 : i32
    %c0_i32_1 = arith.constant 0 : i32
    return %c0_i32, %c0_i32_0 : i32, i32
  }
  func.func @transform_7(%arg0: i32) -> (i32, i32) {
    %c0_i32 = arith.constant 0 : i32
    %c0_i32_0 = arith.constant 0 : i32
    return %arg0, %c0_i32 : i32, i32
  }
  func.func @transform_8(%arg0: i32) -> (i32, i32) {
    %c0_i32 = arith.constant 0 : i32
    %c0_i32_0 = arith.constant 0 : i32
    return %arg0, %c0_i32 : i32, i32
  }
}

</mosaic_0001>

<bundles_post_ra>
// kernel: tpu_custom_call.1
= control target key start
LH: loop header
LB: loop body
LE: loop exit
PB: predicated region body
PF: predicated region fallthrough
CT: control target
= control target key end

     0   :  { %13 = vsyncpa [#allocation4], 0  ;;  %s620_s0 = inlined_call_operand.hbm [shape: f32[8,16], index: 0, kind: input, shape index: {}]   ;;  %s621_s1 = inlined_call_operand.hbm [shape: f32[16,128], index: 1, kind: input, shape index: {}]   ;;  %s622_s2 = inlined_call_operand.vmem [shape: f32[1,128], index: 2, kind: input, shape index: {}]   ;;  %s623_s3 = inlined_call_operand.hbm [shape: f32[128,128], index: 3, kind: input, shape index: {}]   ;;  %s624_s4 = inlined_call_operand.hbm [shape: f32[1,128], index: 4, kind: input, shape index: {}]   ;;  %s625_s5 = inlined_call_operand.hbm [shape: f32[128,256], index: 5, kind: input, shape index: {}]   ;;  %s626_s6 = inlined_call_operand.vmem [shape: f32[1,256], index: 6, kind: input, shape index: {}]   ;;  %s627_s7 = inlined_call_operand.hbm [shape: f32[8,8], index: 7, kind: input, shape index: {}]   ;;  %s628_s8 = inlined_call_operand.hbm [shape: f32[8,128], index: 8, kind: output, shape index: {}]  }
   0x1   :  { %14 = vsyncpa [#allocation7], 0 }
   0x2   :  { %15 = vsyncpa [#allocation10], 0 }
   0x3   :  { %16 = vsyncpa [#allocation13], 0  ;;  %s33_s29 = sshll.u32 %s621_s1, 4  ;;  %s34_s29 = int_to_ptr.hbm [resolvable:$true] %s33_s29 }
   0x4   :  { %17 = vsyncpa [#allocation5], 0  ;;  %s536_s30 = smov [#allocation6]   ;;  %s62_s12 = sshll.u32 %s624_s4, 4  ;;  %s63_s12 = int_to_ptr.hbm [resolvable:$true] %s62_s12 }
   0x5   :  { %s35_s9 = sshll.u32 %s536_s30, 4  ;;  %s537_s13 = smov 128   ;;  %s36_s9 = int_to_ptr.vmem [resolvable:$true] %s35_s9 }
   0x6   :  { %s538_s14 = smov 8   ;;  %s539_s15 = smov [#allocation9]  }
   0x7   :  { %41 = dma.hbm_to_vmem [thread:$0]  %s34_s29, 256, %s36_s9, [#allocation7], %s537_s13, %s537_s13, %s538_s14  }
   0x8   :  { %s64_s16 = sshll.u32 %s539_s15, 4  ;;  %s23_s19 = sshll.u32 %s620_s0, 4  ;;  %s65_s16 = int_to_ptr.vmem [resolvable:$true] %s64_s16  ;;  %s24_s19 = int_to_ptr.hbm [resolvable:$true] %s23_s19 }
   0x9   :  { %67 = dma.hbm_to_vmem [thread:$0]  %s63_s12, 16, %s65_s16, [#allocation10]  }
   0xa   :  { %s48_s21 = sshll.u32 %s623_s3, 4  ;;  %s540_s22 = smov [#allocation3]   ;;  %s49_s21 = int_to_ptr.hbm [resolvable:$true] %s48_s21 }
   0xb   :  { %s25_s23 = sshll.u32 %s540_s22, 4  ;;  %s541_s4 = smov [#allocation8]   ;;  %s26_s23 = int_to_ptr.vmem [resolvable:$true] %s25_s23 }
   0xc   :  { %28 = dma.hbm_to_vmem [thread:$0]  %s24_s19, 128, %s26_s23, [#allocation4]  }
   0xd   :  { %s50_s24 = sshll.u32 %s541_s4, 4  ;;  %s72_s27 = sshll.u32 %s625_s5, 4  ;;  %s51_s24 = int_to_ptr.vmem [resolvable:$true] %s50_s24  ;;  %s73_s27 = int_to_ptr.hbm [resolvable:$true] %s72_s27 }
   0xe   :  { %56 = dma.hbm_to_vmem [thread:$0]  %s49_s21, 2048, %s51_s24, [#allocation7], %s537_s13, %s537_s13, %s538_s14  }
   0xf   :  { %s542_s0 = smov [#allocation11]   ;;  %s88_s3 = sshll.u32 %s627_s7, 4  ;;  %s89_s3 = int_to_ptr.hbm [resolvable:$true] %s88_s3 }
  0x10   :  { %s74_s28 = sshll.u32 %s542_s0, 4  ;;  %s543_s9 = smov 256   ;;  %s75_s28 = int_to_ptr.vmem [resolvable:$true] %s74_s28 }
  0x11   :  { %s544_s10 = smov 16   ;;  %s545_s11 = smov [#allocation12]  }
  0x12   :  { %80 = dma.hbm_to_vmem [thread:$0]  %s73_s27, 4096, %s75_s28, [#allocation10], %s543_s9, %s543_s9, %s544_s10  }
  0x13   :  { %s90_s12 = sshll.u32 %s545_s11, 4  ;;  %s91_s12 = int_to_ptr.vmem [resolvable:$true] %s90_s12 }
  0x14   :  { %93 = dma.hbm_to_vmem [thread:$0]  %s89_s3, 128, %s91_s12, [#allocation13]  }
  0x15   :  { %526 = dma.done.wait [#allocation4], 128  }
  0x16   :  { %527 = vsyncadd [#allocation4], 4294967168 }
  0x17   :  { %528 = dma.done.wait [#allocation7], 2304  }
  0x18   :  { %529 = vsyncadd [#allocation7], 4294964992 }
  0x19   :  { %530 = dma.done.wait [#allocation10], 4112  }
  0x1a   :  { %531 = vsyncadd [#allocation10], 4294963184 }
  0x1b   :  { %532 = dma.done.wait [#allocation13], 128  }
  0x1c   :  { %533 = vsyncadd [#allocation13], 4294967168  ;;  %v129_v0 = vld [vmem:[#allocation6 + $0x8] sm:$0xff]  ;;  %v128_v1 = vld [vmem:[#allocation6] sm:$0xff]  ;;  %vm134_vm0 = vcmask 130048   ;;  %v546_v59 = vmov 0.0  }
  0x1d   :  { %152 = vmatpush.msra.mxu0 %v129_v0  ;;  %v127_v2 = vld [vmem:[#allocation3] sm:$0xff]  ;;  %v174_v3 = vld [vmem:[#allocation8 + $0x78] sm:$0xff]  ;;  %v173_v4 = vld [vmem:[#allocation8 + $0x70] sm:$0xff]  ;;  %122 = vst [vmem:[#allocation2] sm:$0xff] %v546_v59  ;;  %vm124_vm1 = vcmask 64512   ;;  %s323_s17 = sshll.u32 %s628_s8, 4  ;;  %s324_s17 = int_to_ptr.hbm [resolvable:$true] %s323_s17 }
  0x1e   :  { %179 = vmatpush.msra.mxu1 %v174_v3  ;;  %v172_v5 = vld [vmem:[#allocation8 + $0x68] sm:$0xff]  ;;  %v171_v6 = vld [vmem:[#allocation8 + $0x60] sm:$0xff]  ;;  %v170_v7 = vld [vmem:[#allocation8 + $0x58] sm:$0xff] }
  0x1f   :  { %153 = vmatpush.msra.mxu0 %v128_v1  ;;  %v169_v8 = vld [vmem:[#allocation8 + $0x50] sm:$0xff]  ;;  %v168_v9 = vld [vmem:[#allocation8 + $0x48] sm:$0xff]  ;;  %v167_v10 = vld [vmem:[#allocation8 + $0x40] sm:$0xff] }
  0x20   :  { %336 = vmatmul.msk.f32.vlgmr.msra.gmra.mxu0 %vm134_vm0, %v127_v2  ;;  %180 = vmatpush.msra.mxu1 %v173_v4  ;;  %v166_v11 = vld [vmem:[#allocation8 + $0x38] sm:$0xff]  ;;  %v165_v12 = vld [vmem:[#allocation8 + $0x30] sm:$0xff]  ;;  %v164_v13 = vld [vmem:[#allocation8 + $0x28] sm:$0xff] }
  0x21   :  { %v163_v14 = vld [vmem:[#allocation8 + $0x20] sm:$0xff]  ;;  %v162_v15 = vld [vmem:[#allocation8 + $0x18] sm:$0xff]  ;;  %v161_v16 = vld [vmem:[#allocation8 + $0x10] sm:$0xff] }
  0x22   :  { %181 = vmatpush.msra.mxu1 %v172_v5  ;;  %v160_v17 = vld [vmem:[#allocation8 + $0x8] sm:$0xff]  ;;  %v159_v18 = vld [vmem:[#allocation8] sm:$0xff]  ;;  %v230_v19 = vld [vmem:[#allocation11 + $0xf0] sm:$0xff] }
  0x23   :  { %v231_v20 = vld [vmem:[#allocation11 + $0xf8] sm:$0xff]  ;;  %v228_v21 = vld [vmem:[#allocation11 + $0xe0] sm:$0xff]  ;;  %238 = vmatpush.msra.mxu2 %v230_v19  ;;  %v229_v22 = vld [vmem:[#allocation11 + $0xe8] sm:$0xff] }
  0x24   :  { %182 = vmatpush.msra.mxu1 %v171_v6  ;;  %258 = vmatpush.msra.mxu3 %v231_v20  ;;  %v226_v23 = vld [vmem:[#allocation11 + $0xd0] sm:$0xff]  ;;  %v227_v24 = vld [vmem:[#allocation11 + $0xd8] sm:$0xff]  ;;  %v224_v25 = vld [vmem:[#allocation11 + $0xc0] sm:$0xff] }
  0x25   :  { %239 = vmatpush.msra.mxu2 %v228_v21  ;;  %v225_v26 = vld [vmem:[#allocation11 + $0xc8] sm:$0xff]  ;;  %v222_v27 = vld [vmem:[#allocation11 + $0xb0] sm:$0xff]  ;;  %v223_v28 = vld [vmem:[#allocation11 + $0xb8] sm:$0xff] }
  0x26   :  { %183 = vmatpush.msra.mxu1 %v170_v7  ;;  %259 = vmatpush.msra.mxu3 %v229_v22  ;;  %v220_v29 = vld [vmem:[#allocation11 + $0xa0] sm:$0xff]  ;;  %v221_v30 = vld [vmem:[#allocation11 + $0xa8] sm:$0xff]  ;;  %v218_v31 = vld [vmem:[#allocation11 + $0x90] sm:$0xff] }
  0x27   :  { %240 = vmatpush.msra.mxu2 %v226_v23  ;;  %v219_v32 = vld [vmem:[#allocation11 + $0x98] sm:$0xff]  ;;  %v216_v33 = vld [vmem:[#allocation11 + $0x80] sm:$0xff]  ;;  %v217_v34 = vld [vmem:[#allocation11 + $0x88] sm:$0xff] }
  0x28   :  { %184 = vmatpush.msra.mxu1 %v169_v8  ;;  %260 = vmatpush.msra.mxu3 %v227_v24  ;;  %v214_v35 = vld [vmem:[#allocation11 + $0x70] sm:$0xff]  ;;  %v215_v36 = vld [vmem:[#allocation11 + $0x78] sm:$0xff]  ;;  %v212_v37 = vld [vmem:[#allocation11 + $0x60] sm:$0xff] }
  0x29   :  { %241 = vmatpush.msra.mxu2 %v224_v25  ;;  %v213_v38 = vld [vmem:[#allocation11 + $0x68] sm:$0xff]  ;;  %v210_v39 = vld [vmem:[#allocation11 + $0x50] sm:$0xff]  ;;  %v211_v40 = vld [vmem:[#allocation11 + $0x58] sm:$0xff] }
  0x2a   :  { %185 = vmatpush.msra.mxu1 %v168_v9  ;;  %261 = vmatpush.msra.mxu3 %v225_v26  ;;  %v208_v41 = vld [vmem:[#allocation11 + $0x40] sm:$0xff]  ;;  %v209_v42 = vld [vmem:[#allocation11 + $0x48] sm:$0xff]  ;;  %v206_v43 = vld [vmem:[#allocation11 + $0x30] sm:$0xff] }
  0x2b   :  { %242 = vmatpush.msra.mxu2 %v222_v27  ;;  %v207_v44 = vld [vmem:[#allocation11 + $0x38] sm:$0xff]  ;;  %v204_v49 = vld [vmem:[#allocation11 + $0x20] sm:$0xff]  ;;  %v205_v50 = vld [vmem:[#allocation11 + $0x28] sm:$0xff] }
  0x2c   :  { %186 = vmatpush.msra.mxu1 %v167_v10  ;;  %262 = vmatpush.msra.mxu3 %v223_v28  ;;  %v350_v45 = vld [vmem:[%s622_s2] ss:$0 sm:$0xff]  ;;  %v202_v51 = vld [vmem:[#allocation11 + $0x10] sm:$0xff]  ;;  %v200_v53 = vld [vmem:[#allocation11] sm:$0xff] }
  0x2d   :  { %243 = vmatpush.msra.mxu2 %v220_v29  ;;  %v203_v52 = vld [vmem:[#allocation11 + $0x18] sm:$0xff]  ;;  %v201_v54 = vld [vmem:[#allocation11 + $0x8] sm:$0xff]  ;;  %v123_v60 = vld [vmem:[#allocation12] sm:$0xff] }
  0x2e   :  { %187 = vmatpush.msra.mxu1 %v166_v11  ;;  %263 = vmatpush.msra.mxu3 %v221_v30  ;;  %v351_v55 = vld [vmem:[#allocation9] ss:$0 sm:$0xff]  ;;  %125 = vst.msk [vmem:[#allocation2] sm:$0xff] %vm124_vm1, %v123_v60 }
  0x2f   :  { %244 = vmatpush.msra.mxu2 %v218_v31  ;;  %v232_v61 = vld [vmem:[%s626_s6] sm:$0x3]  ;;  %s547_s6 = smov [#allocation14]  }
  0x30   :  { %188 = vmatpush.msra.mxu1 %v165_v12  ;;  %264 = vmatpush.msra.mxu3 %v219_v32  ;;  %v235_v62 = vperm.slane %v232_v61, 1  ;;  %v234_v4 = vperm.slane %v232_v61, 0  ;;  %s321_s14 = sshll.u32 %s547_s6, 4  ;;  %s322_s14 = int_to_ptr.vmem [resolvable:$true] %s321_s14 }
  0x31   :  { %245 = vmatpush.msra.mxu2 %v216_v33  ;;  %v310_v33 = vlaneseq }
  0x32   :  { %189 = vmatpush.msra.mxu1 %v164_v13  ;;  %265 = vmatpush.msra.mxu3 %v217_v34 }
  0x33   :  { %246 = vmatpush.msra.mxu2 %v214_v35  ;;  %v311_v34 = vand.u32 127, %v310_v33 }
  0x34   :  { %190 = vmatpush.msra.mxu1 %v163_v14  ;;  %266 = vmatpush.msra.mxu3 %v215_v36 }
  0x35   :  { %247 = vmatpush.msra.mxu2 %v212_v37  ;;  %v126_v7 = vld [vmem:[#allocation2] sm:$0xff]  ;;  %vm312_vm3 = vcmp.eq.s32.totalorder %v311_v34, 8 }
  0x36   :  { %191 = vmatpush.msra.mxu1 %v162_v15  ;;  %267 = vmatpush.msra.mxu3 %v213_v38  ;;  %v303_v21 = vmul.f32 -0.5, %v126_v7 }
  0x37   :  { %248 = vmatpush.msra.mxu2 %v210_v39 }
  0x38   :  { %192 = vmatpush.msra.mxu1 %v161_v16  ;;  %268 = vmatpush.msra.mxu3 %v211_v40  ;;  %v304_v28 = vmul.f32 %v303_v21, %v126_v7 }
  0x39   :  { %249 = vmatpush.msra.mxu2 %v208_v41 }
  0x3a   :  { %193 = vmatpush.msra.mxu1 %v160_v17  ;;  %269 = vmatpush.msra.mxu3 %v209_v42 }
  0x3b   :  { %250 = vmatpush.msra.mxu2 %v206_v43 }
  0x3c   :  { %194 = vmatpush.msra.mxu1 %v159_v18  ;;  %270 = vmatpush.msra.mxu3 %v207_v44 }
  0x3d   :  { %251 = vmatpush.msra.mxu2 %v204_v49 }
  0x3e   :  { %271 = vmatpush.msra.mxu3 %v205_v50 }
  0x3f   :  { %252 = vmatpush.msra.mxu2 %v202_v51 }
  0x40   :  { %272 = vmatpush.msra.mxu3 %v203_v52 }
  0x41   :  { %253 = vmatpush.msra.mxu2 %v200_v53 }
  0x42   :  { %273 = vmatpush.msra.mxu3 %v201_v54 }
  0x9d   :  { %v155_v46 = vpop.f32.mrf.mxu0 }
  0x9e   :  { %v156_v47 = vadd.f32 %v350_v45, %v155_v46 }
  0xa0   :  { %v158_v48 = vmax.f32 %v156_v47, 0.0 }
  0xa2   :  { %195 = vmatmul.f32.vlgmr.msra.gmra.mxu1 %v158_v48 }
 0x11f   :  { %v196_v56 = vpop.f32.mrf.mxu1 }
 0x120   :  { %v197_v57 = vadd.f32 %v351_v55, %v196_v56 }
 0x122   :  { %v199_v58 = vmax.f32 %v197_v57, 0.0 }
 0x124   :  { %254 = vmatmul.f32.vlgmr.msra.gmra.mxu2 %v199_v58  ;;  %274 = vmatmul.f32.vlgmr.msra.gmra.mxu3 %v199_v58 }
 0x1a7   :  { %v275_v63 = vpop.f32.mrf.mxu3  ;;  %v255_v5 = vpop.f32.mrf.mxu2 }
 0x1a8   :  { %v276_v0 = vadd.f32 %v275_v63, %v235_v62  ;;  %v256_v8 = vadd.f32 %v255_v5, %v234_v4 }
 0x1aa   :  { %v278_v1 = vmax.f32 %v276_v0, -20.0 }
 0x1ac   :  { %v279_v2 = vmin.f32 %v278_v1, 2.0 }
 0x1ae   :  { %v280_v3 = vmul.f32 1.442695, %v279_v2  ;;  %v305_v31 = vsub.f32 %v304_v28, %v279_v2 }
 0x1b0   :  { %352 = vpow2.f32 %v280_v3 }
 0x1b6   :  { %v353_v6 = vpop.eup %352 }
 0x1b7   :  { %v282_v9 = vmul.f32 %v353_v6, %v126_v7 }
 0x1b9   :  { %v283_v10 = vadd.f32 %v282_v9, %v256_v8 }
 0x1bb   :  { %v284_v11 = vmul.f32 -2.0, %v283_v10  ;;  %v300_v27 = vsub.f32 0.6931472, %v283_v10 }
 0x1bd   :  { %v286_v12 = vand.u32 2147483647, %v284_v11  ;;  %v285_v24 = vmax.f32 %v284_v11, 0.0 }
 0x1bf   :  { %v287_v13 = vsub.f32 0.0, %v286_v12 }
 0x1c1   :  { %v288_v14 = vmul.f32 1.442695, %v287_v13 }
 0x1c3   :  { %354 = vpow2.f32 %v288_v14 }
 0x1c9   :  { %v355_v15 = vpop.eup %354 }
 0x1ca   :  { %v290_v16 = vadd.f32 1.0, %v355_v15  ;;  %v293_v17 = vmul.f32 -0.5, %v355_v15  ;;  %v296_v19 = vand.u32 2147483647, %v355_v15 }
 0x1cc   :  { %356 = vlog2.f32 %v290_v16  ;;  %v294_v18 = vadd.f32 1.0, %v293_v17  ;;  %vm297_vm2 = vcmp.lt.f32.partialorder %v296_v19, 0.0004427343 }
 0x1ce   :  { %v295_v23 = vmul.f32 %v355_v15, %v294_v18 }
 0x1d2   :  { %v357_v20 = vpop.eup %356 }
 0x1d3   :  { %v292_v22 = vmul.f32 0.6931472, %v357_v20 }
 0x1d5   :  { %v298_v25 = vsel %vm297_vm2, %v295_v23, %v292_v22 }
 0x1d6   :  { %v299_v26 = vadd.f32 %v298_v25, %v285_v24 }
 0x1d8   :  { %v301_v29 = vsub.f32 %v300_v27, %v299_v26 }
 0x1da   :  { %v302_v30 = vmul.f32 2.0, %v301_v29 }
 0x1dc   :  { %v306_v32 = vsub.f32 %v305_v31, %v302_v30 }
 0x1de   :  { %307 = vadd.xlane.f32.xlu0 %v306_v32 }
 0x251   :  { %v308_v35 = vpop.xlane.xlu0 %307 }
 0x252   :  { %v337_v36 = vadd.f32 -7.351508, %v308_v35 }
 0x254   :  { %v313_v37 = vadd.f32 %v337_v36, %v283_v10 }
 0x256   :  { %v314_v38 = vsel %vm312_vm3, %v313_v37, %v283_v10 }
 0x257   :  { %315 = vst [vmem:[#allocation14] sm:$0xff] %v314_v38 }
 0x258   :  { %326 = dma.vmem_to_hbm [thread:$0]  %s322_s14, 128, %s324_s17, [#allocation5]  }
 0x259   :  { %534 = dma.done.wait [#allocation5], 128  }
 0x25a   :  { %535 = vsyncadd [#allocation5], 4294967168 }
 0x25b   :  { %331 = vsyncpa [#allocation4], 1 }
 0x25c   :  { %332 = vsyncpa [#allocation7], 1 }
 0x25d   :  { %333 = vsyncpa [#allocation10], 1 }
 0x25e   :  { %334 = vsyncpa [#allocation13], 1 }
 0x25f   :  { %335 = vsyncpa [#allocation5], 1 }

</bundles_post_ra>
